<compile_context>
chip_gen: v6e
topology: v6e:2x2x1
jax: 0.10.0
libtpu: 0.0.40
codegen_flags: <defaults>
</compile_context>

<pallas_src>
import functools

import jax
import jax.numpy as jnp
from jax.experimental import pallas as pl
from jax.experimental.pallas import tpu as pltpu


def glu_layer_kernel(x_ref, wa_ref, wg_ref, o_ref):
    # x_ref: (TB, Cin) bf16, wa_ref/wg_ref: (Cin, Cout_pad) bf16,
    # o_ref: (TB, Cout_pad) out dtype.
    x = x_ref[...]
    a = jnp.dot(x, wa_ref[...], preferred_element_type=jnp.float32)
    g = jnp.dot(x, wg_ref[...], preferred_element_type=jnp.float32)
    o_ref[...] = (a * jax.nn.sigmoid(g)).astype(o_ref.dtype)


def glu_layer(x, weight, *, block_b=512, compute_dtype=jnp.bfloat16):
    """x: (B, Cin); weight: (2*Cout, Cin) -- PyTorch Linear layout."""
    B, Cin = x.shape
    two_cout, Cin_w = weight.shape
    assert Cin == Cin_w and two_cout % 2 == 0
    Cout = two_cout // 2
    out_dtype = x.dtype

    # --- wrapper-side glue (not the hot path) ---------------------------------
    # Split into a/g halves, pre-transpose to (Cin, Cout), cast to bf16.
    w_a = weight[:Cout].T.astype(compute_dtype)
    w_g = weight[Cout:].T.astype(compute_dtype)

    # Lane-dense output: pad the N dimension up to a multiple of 128 with zeros.
    if Cout % 128 == 0:
        cout_pad = Cout
    else:
        cout_pad = ((Cout + 127) // 128) * 128
        pad = ((0, 0), (0, cout_pad - Cout))
        w_a = jnp.pad(w_a, pad)
        w_g = jnp.pad(w_g, pad)

    x_c = x.astype(compute_dtype)

    # Batch tile: full B if it fits in one tile, otherwise a multiple of 8 rows.
    tb = min(block_b, B)
    if tb != B:
        tb = max(8, (tb // 8) * 8)
    grid = (pl.cdiv(B, tb),)

    # Advisory cost hint for the XLA scheduler.
    itemsize_in = jnp.dtype(compute_dtype).itemsize
    itemsize_out = jnp.dtype(out_dtype).itemsize
    cost = pl.CostEstimate(
        flops=2 * B * Cin * (2 * cout_pad),
        transcendentals=B * cout_pad,
        bytes_accessed=(B * Cin * itemsize_in
                        + 2 * Cin * cout_pad * itemsize_in
                        + B * cout_pad * itemsize_out),
    )

    out = pl.pallas_call(
        glu_layer_kernel,
        out_shape=jax.ShapeDtypeStruct((B, cout_pad), out_dtype),
        grid_spec=pltpu.PrefetchScalarGridSpec(
            num_scalar_prefetch=0,
            grid=grid,
            in_specs=[
                pl.BlockSpec((tb, Cin), lambda i: (i, 0)),
                pl.BlockSpec((Cin, cout_pad), lambda i: (0, 0)),  # VMEM-resident
                pl.BlockSpec((Cin, cout_pad), lambda i: (0, 0)),  # VMEM-resident
            ],
            out_specs=pl.BlockSpec((tb, cout_pad), lambda i: (i, 0)),
        ),
        compiler_params=pltpu.CompilerParams(
            dimension_semantics=("parallel",),
            vmem_limit_bytes=32 * 1024 * 1024,
        ),
        cost_estimate=cost,
    )(x_c, w_a, w_g)

    if cout_pad != Cout:
        out = out[:, :Cout]
    return out


def reference_glu_layer_bf16(x, weight, compute_dtype=jnp.bfloat16):
    """Reference with the same bf16-in / f32-accumulate numerics as the kernel."""
    cout = weight.shape[0] // 2
    xb = x.astype(compute_dtype)
    a = jnp.dot(xb, weight[:cout].T.astype(compute_dtype),
                preferred_element_type=jnp.float32)
    g = jnp.dot(xb, weight[cout:].T.astype(compute_dtype),
                preferred_element_type=jnp.float32)
    return (a * jax.nn.sigmoid(g)).astype(x.dtype)


def reference_glu_layer_f32(x, weight):
    z = x @ weight.T
    cout = weight.shape[0] // 2
    return z[:, :cout] * jax.nn.sigmoid(z[:, cout:])


if __name__ == "__main__":
    key = jax.random.PRNGKey(0)
    k_x, k_w = jax.random.split(key)

    batch = 8
    in_channels = 32
    out_channels = 16

    # Deterministic synthetic params mimicking torch.nn.Linear.reset_parameters
    # (kaiming_uniform -> U(-bound, bound) with bound = 1/sqrt(in_channels)).
    bound = 1.0 / (in_channels ** 0.5)
    weight = jax.random.uniform(
        k_w, (out_channels * 2, in_channels), dtype=jnp.float32,
        minval=-bound, maxval=bound)

    x = jax.random.normal(k_x, (batch, in_channels), dtype=jnp.float32)

    glu_fn = jax.jit(functools.partial(glu_layer))
    out = glu_fn(x, weight)
    out = jax.block_until_ready(out)
    assert out.shape == (batch, out_channels)

    # Same-numerics reference (bf16 inputs, f32 accumulate).
    ref_bf16 = reference_glu_layer_bf16(x, weight)
    assert jnp.allclose(out, ref_bf16, atol=1e-3, rtol=1e-3)

    # Sanity check against the full-f32 PyTorch-equivalent reference
    # (looser tolerance to absorb the bf16 input cast).
    ref_f32 = reference_glu_layer_f32(x, weight)
    assert jnp.allclose(out, ref_f32, atol=2e-2, rtol=2e-2)

    print("KERNEL_OK")
</pallas_src>

<mosaic_0001>
module attributes {stable_mosaic.version = 11 : i64} {
  func.func @glu_layer_kernel(%arg0: i32, %arg1: memref<8x32xbf16, #tpu.memory_space<vmem>>, %arg2: memref<32x128xbf16, #tpu.memory_space<vmem>>, %arg3: memref<32x128xbf16, #tpu.memory_space<vmem>>, %arg4: memref<8x128xf32, #tpu.memory_space<vmem>>) attributes {dimension_semantics = [#tpu.dimension_semantics<parallel>], iteration_bounds = array<i64: 1>, scalar_prefetch = 0 : i64, scratch_operands = 0 : i64, tpu.core_type = #tpu.core_type<tc>, window_params = [{transform_indices = @transform_0, window_bounds = array<i64: 8, 32>}, {pipeline_mode = #tpu.pipeline_mode<synchronous>, transform_indices = @transform_1, window_bounds = array<i64: 32, 128>}, {pipeline_mode = #tpu.pipeline_mode<synchronous>, transform_indices = @transform_2, window_bounds = array<i64: 32, 128>}, {transform_indices = @transform_3, window_bounds = array<i64: 8, 128>}]} {
    %c0 = arith.constant 0 : index
    %c0_0 = arith.constant 0 : index
    %0 = vector.load %arg1[%c0, %c0_0] : memref<8x32xbf16, #tpu.memory_space<vmem>>, vector<8x32xbf16>
    %c0_1 = arith.constant 0 : index
    %c0_2 = arith.constant 0 : index
    %1 = vector.load %arg2[%c0_1, %c0_2] : memref<32x128xbf16, #tpu.memory_space<vmem>>, vector<32x128xbf16>
    %cst = arith.constant dense<0.000000e+00> : vector<8x128xf32>
    %2 = tpu.matmul %0, %1, %cst {dimension_numbers = #tpu.dot_dimension_numbers<[1], [0], [0], [1], [0, 0, 1, 1], [], []>} : vector<8x32xbf16>, vector<32x128xbf16>, vector<8x128xf32> -> vector<8x128xf32>
    %c0_3 = arith.constant 0 : index
    %c0_4 = arith.constant 0 : index
    %3 = vector.load %arg3[%c0_3, %c0_4] : memref<32x128xbf16, #tpu.memory_space<vmem>>, vector<32x128xbf16>
    %cst_5 = arith.constant dense<0.000000e+00> : vector<8x128xf32>
    %4 = tpu.matmul %0, %3, %cst_5 {dimension_numbers = #tpu.dot_dimension_numbers<[1], [0], [0], [1], [0, 0, 1, 1], [], []>} : vector<8x32xbf16>, vector<32x128xbf16>, vector<8x128xf32> -> vector<8x128xf32>
    %5 = arith.negf %4 : vector<8x128xf32>
    %6 = math.exp %5 : vector<8x128xf32>
    %cst_6 = arith.constant 1.000000e+00 : f32
    %7 = vector.broadcast %cst_6 : f32 to vector<8x128xf32>
    %8 = arith.addf %7, %6 : vector<8x128xf32>
    %9 = arith.divf %7, %8 : vector<8x128xf32>
    %10 = arith.mulf %2, %9 : vector<8x128xf32>
    %c0_7 = arith.constant 0 : index
    %c0_8 = arith.constant 0 : index
    %11 = vector.load %arg4[%c0_7, %c0_8] : memref<8x128xf32, #tpu.memory_space<vmem>>, vector<8x128xf32>
    tpu.vector_store %arg4[%c0_7, %c0_8], %10 {strides = array<i32>} : memref<8x128xf32, #tpu.memory_space<vmem>>, vector<8x128xf32>,
    return
  }
  func.func @transform_0(%arg0: i32) -> (i32, i32) {
    %c0_i32 = arith.constant 0 : i32
    %c0_i32_0 = arith.constant 0 : i32
    return %arg0, %c0_i32 : i32, i32
  }
  func.func @transform_1(%arg0: i32) -> (i32, i32) {
    %c0_i32 = arith.constant 0 : i32
    %c0_i32_0 = arith.constant 0 : i32
    %c0_i32_1 = arith.constant 0 : i32
    return %c0_i32, %c0_i32_0 : i32, i32
  }
  func.func @transform_2(%arg0: i32) -> (i32, i32) {
    %c0_i32 = arith.constant 0 : i32
    %c0_i32_0 = arith.constant 0 : i32
    %c0_i32_1 = arith.constant 0 : i32
    return %c0_i32, %c0_i32_0 : i32, i32
  }
  func.func @transform_3(%arg0: i32) -> (i32, i32) {
    %c0_i32 = arith.constant 0 : i32
    %c0_i32_0 = arith.constant 0 : i32
    return %arg0, %c0_i32 : i32, i32
  }
}

</mosaic_0001>

<bundles_post_ra>
// kernel: glu_layer.1
= control target key start
LH: loop header
LB: loop body
LE: loop exit
PB: predicated region body
PF: predicated region fallthrough
CT: control target
= control target key end

     0   :  { %v217_v1 = vmov 0.0   ;;  %vm218_vm0 = vmmov 0   ;;  %s258_s0 = inlined_call_operand.vmem [shape: bf16[8,32], index: 0, kind: input, shape index: {}]   ;;  %s259_s1 = inlined_call_operand.vmem [shape: bf16[32,128], index: 1, kind: input, shape index: {}]   ;;  %s260_s2 = inlined_call_operand.vmem [shape: bf16[32,128], index: 2, kind: input, shape index: {}]   ;;  %s261_s3 = inlined_call_operand.hbm [shape: f32[8,128], index: 3, kind: output, shape index: {}]  }
   0x1   :  { %v187_v0 = vld [vmem:[%s260_s2 + $0x8] sm:$0xff]   ;;  %176 = vmatprep.subr.bf16.mxu1 %v217_v1  ;;  %168 = vmatprep.subr.bf16.mxu0 %v217_v1  ;;  %v188_v2 = vld [vmem:[%s260_s2] sm:$0xff]  }
   0x2   :  { %177 = vmatpush3.bf16.msra.mxu1 %v187_v0  ;;  %180 = vmatprep.mubr.msk.bf16.mxu1 %vm218_vm0, %v217_v1  ;;  %v189_v3 = vld [vmem:[%s259_s1 + $0x8] sm:$0xff]   ;;  %v190_v4 = vld [vmem:[%s259_s1] sm:$0xff]  }
   0x3   :  { %178 = vmatprep.subr.bf16.mxu1 %v217_v1  ;;  %172 = vmatprep.mubr.msk.bf16.mxu0 %vm218_vm0, %v217_v1 }
   0x4   :  { %169 = vmatpush3.bf16.msra.mxu0 %v189_v3 }
   0x5   :  { %8 = vsyncpa [#allocation3], 0  ;;  %170 = vmatprep.subr.bf16.mxu0 %v217_v1  ;;  %v16_v5 = vld [vmem:[%s258_s0] sm:$0xf]  ;;  %vm33_vm1 = vcmask 261120   ;;  %s219_s1 = smov [#allocation2]  }
   0x6   :  { %179 = vmatpush3.bf16.msra.mxu1 %v188_v2  ;;  %s147_s2 = sshll.u32 %s219_s1, 4  ;;  %s148_s2 = int_to_ptr.vmem [resolvable:$true] %s147_s2 }
   0x7   :  { %s195_s0 = scalar_lea.vmem %s148_s2, 128  ;;  %p200_p1 = scmp.lt.s32.totalorder %s148_s2, %s148_s2 }
   0x8   :  { %171 = vmatpush3.bf16.msra.mxu0 %v190_v4  ;;  %p196_p0 = scmp.ne.s32.totalorder %s148_s2, %s195_s0  ;;  %p201_p2 = scmp.lt.s32.totalorder %s195_s0, %s195_s0 }
   0x9   :  { %181 = vmatmul.mubr.msk.bf16.vlgmr.msra.gmra.mxu1 %vm33_vm1, %v16_v5 }
   0xa   :  { %p202_p3 = por %p201_p2, %p200_p1 }
   0xb   :  { %173 = vmatmul.mubr.msk.bf16.vlgmr.msra.gmra.mxu0 %vm33_vm1, %v16_v5 }
   0xc   :  { %p203_p4 = pnand %p202_p3, %p196_p0 }
  0xc9   :  { %v127_v6 = vpop.f32.mrf.mxu1 }
  0xca   :  { %v161_v7 = vmul.f32 -1.442695, %v127_v6 }
  0xcb   :  { %v182_v8 = vpop.f32.mrf.mxu1  ;;  %v71_v9 = vpop.f32.mrf.mxu0 }
  0xcc   :  { %191 = vpow2.f32 %v161_v7 }
  0xcd   :  { %v130_v10 = vpop.f32.mrf.mxu1  ;;  %v174_v11 = vpop.f32.mrf.mxu0 }
  0xcf   :  { %v183_v12 = vpop.f32.mrf.mxu1  ;;  %v74_v13 = vpop.f32.mrf.mxu0 }
  0xd1   :  { %v175_v14 = vpop.f32.mrf.mxu0 }
  0xd9   :  { %v192_v15 = vpop.eup %191 }
  0xda   :  { %v136_v16 = vadd.f32 1.0, %v192_v15 }
  0xdc   :  { %193 = vrcp.f32 %v136_v16 }
  0xe9   :  { %v194_v17 = vpop.eup %193 }
  0xea   :  { %v139_v18 = vmul.f32 %v194_v17, %v71_v9 }
  0xec   :  { %140 = vst [vmem:[#allocation2] sm:$0xff] %v139_v18 }
  0xed   :  { %206 = shalt.err (!%p203_p4)
}
  0xee   :  { %150 = dma.vmem_to_hbm [thread:$0]  %s148_s2, 128, %s261_s3, [#allocation3]  }
  0xef   :  { %215 = dma.done.wait [#allocation3], 128  }
  0xf0   :  { %216 = vsyncadd [#allocation3], 4294967168 }
  0xf1   :  { %154 = vsyncpa [#allocation3], 1 }

</bundles_post_ra>
